<compile_context>
chip_gen: v7x
topology: tpu7x:2x2x1
jax: 0.10.0
libtpu: 0.0.40
codegen_flags: <defaults>
</compile_context>

<pallas_src>
import jax
import jax.numpy as jnp
from jax import lax
from jax.experimental import pallas as pl
from jax.experimental.pallas import tpu as pltpu


# ----------------------------------------------------------------------------------- #
# Kernel
# ----------------------------------------------------------------------------------- #
def _fused_gcn_kernel(a_ref, x_ref, w1_ref, w2_ref, b_ref, o_ref,
                      acc1_ref, acc2_ref, z_ref):
    """Fused 2-layer GCN.

    grid = (phase, dest-row tile i, source tile j)
      phase 0:  acc1[i] += A[i,j] @ x[j]        (bf16 MXU, f32 acc)
                at j==last:  h = relu(acc1 @ W1 + b1)
                             z[i] = (h @ W2)    -> VMEM scratch (bf16)
      phase 1:  acc2[i] += A[i,j] @ z[j]        (bf16 MXU, f32 acc, init = b2)
                at j==last:  out[i] = acc2
    """
    p = pl.program_id(0)          # 0: layer-1 pass, 1: layer-2 pass
    i = pl.program_id(1)          # destination-node (output row) tile
    j = pl.program_id(2)          # source-node tile (reduction axis)
    nj = pl.num_programs(2)

    # ---------------- phase 0: h = relu(A_hat @ X @ W1 + b1);  z = h @ W2 ----------- #
    @pl.when(p == 0)
    def _layer1():
        @pl.when(j == 0)
        def _():
            acc1_ref[...] = jnp.zeros_like(acc1_ref)

        # Big N^2 matmul: aggregate raw (padded) source features, bf16 in / f32 out.
        acc1_ref[...] += jnp.dot(a_ref[...], x_ref[...],
                                 preferred_element_type=jnp.float32)

        @pl.when(j == nj - 1)
        def _():
            h_width = w1_ref.shape[1]
            h = jnp.dot(acc1_ref[...], w1_ref[...],
                        preferred_element_type=jnp.float32)
            h = jnp.maximum(h + b_ref[0:1, 0:h_width], 0.0)     # + b1, relu
            # F.dropout(p=0.0) is the identity -> nothing to do.
            # Reassociation: compute the thin projection now so phase 1's N^2 matmul
            # runs at the class width.
            z = jnp.dot(h, w2_ref[...], preferred_element_type=jnp.float32)
            z_ref[i] = z.astype(z_ref.dtype)

    # ---------------- phase 1: out = A_hat @ z + b2 --------------------------------- #
    @pl.when(p == 1)
    def _layer2():
        @pl.when(j == 0)
        def _():
            acc2_ref[...] = jnp.broadcast_to(
                b_ref[1:2, 0:acc2_ref.shape[-1]], acc2_ref.shape)   # bias folded in init

        acc2_ref[...] += jnp.dot(a_ref[...], z_ref[j],
                                 preferred_element_type=jnp.float32)

        @pl.when(j == nj - 1)
        def _():
            o_ref[...] = acc2_ref[...].astype(o_ref.dtype)


# ----------------------------------------------------------------------------------- #
# Wrapper / host-side glue
# ----------------------------------------------------------------------------------- #
def _round_up(v, m):
    return ((v + m - 1) // m) * m


def _pad2d(arr, rows, cols, dtype):
    out = jnp.zeros((rows, cols), dtype)
    return out.at[: arr.shape[0], : arr.shape[1]].set(arr.astype(dtype))


def build_gcn_adjacency(edge_index, num_nodes):
    """Dense D^{-1/2} (A + I) D^{-1/2} from a [2, E] (src, dst) edge list.

    Matches GCNConv's gcn_norm (fill_value=1): existing self-loop edges are replaced
    by a single unit self-loop.  Scatter-add stays in plain JAX (no dense Pallas scatter).
    """
    src, dst = edge_index[0], edge_index[1]
    a = jnp.zeros((num_nodes, num_nodes), jnp.float32).at[dst, src].add(1.0)
    eye = jnp.eye(num_nodes, dtype=jnp.float32)
    a = a * (1.0 - eye) + eye                       # replace diagonal with unit self-loops
    deg = a.sum(axis=1)
    d_inv_sqrt = jnp.where(deg > 0.0, lax.rsqrt(deg), 0.0)
    return (d_inv_sqrt[:, None] * a) * d_inv_sqrt[None, :]


def simple_gcn_forward(x, edge_index, params, *, tile_n=None):
    """Full SimpleGCN forward: conv1 -> relu -> dropout(p=0) -> conv2 (one pallas_call)."""
    n, f_in = x.shape
    hidden = params["w1"].shape[1]
    n_cls = params["w2"].shape[1]

    a_norm = build_gcn_adjacency(edge_index, n)     # f32 [N, N]

    # ---- padding: lane dims -> multiples of 128, node dim -> multiple of row tile ---
    if tile_n is None:
        tile_n = min(256, _round_up(n, 128))
    n_pad = _round_up(n, tile_n)
    f_pad = _round_up(f_in, 128)
    h_pad = _round_up(hidden, 128)
    c_pad = _round_up(n_cls, 128)
    bw = max(h_pad, c_pad)
    n_tiles = n_pad // tile_n

    # bf16 feed for the two N^2 matmul operands (halves HBM bytes, native MXU rate).
    a_pad = _pad2d(a_norm, n_pad, n_pad, jnp.bfloat16)
    x_pad = _pad2d(x, n_pad, f_pad, jnp.bfloat16)
    w1_pad = _pad2d(params["w1"], f_pad, h_pad, jnp.float32)
    w2_pad = _pad2d(params["w2"], h_pad, c_pad, jnp.float32)
    b_stack = jnp.zeros((2, bw), jnp.float32)
    b_stack = b_stack.at[0, :hidden].set(params["b1"])
    b_stack = b_stack.at[1, :n_cls].set(params["b2"])

    grid = (2, n_tiles, n_tiles)   # (phase, dest-row tile, source tile [reduction, last])

    out_pad = pl.pallas_call(
        _fused_gcn_kernel,
        out_shape=jax.ShapeDtypeStruct((n_pad, c_pad), jnp.float32),
        grid_spec=pltpu.PrefetchScalarGridSpec(
            num_scalar_prefetch=0,
            grid=grid,
            in_specs=[
                # normalized adjacency tile A[i, j]
                pl.BlockSpec((tile_n, tile_n), lambda p, i, j: (i, j)),
                # source-node features x[j]; pinned to block 0 during phase 1 (unused)
                pl.BlockSpec((tile_n, f_pad), lambda p, i, j: (j * (1 - p), 0)),
                # weights: constant index -> DMA'd once, stay resident
                pl.BlockSpec((f_pad, h_pad), lambda p, i, j: (0, 0)),
                pl.BlockSpec((h_pad, c_pad), lambda p, i, j: (0, 0)),
                # stacked biases [b1; b2], lane-padded, single operand
                pl.BlockSpec((2, bw), lambda p, i, j: (0, 0)),
            ],
            # pinned to block (0,0) during phase 0 so no unwritten block is flushed.
            out_specs=pl.BlockSpec((tile_n, c_pad), lambda p, i, j: (i * p, 0)),
            scratch_shapes=[
                pltpu.VMEM((tile_n, f_pad), jnp.float32),            # layer-1 accumulator
                pltpu.VMEM((tile_n, c_pad), jnp.float32),            # layer-2 accumulator
                pltpu.VMEM((n_tiles, tile_n, c_pad), jnp.bfloat16),  # z = h @ W2 (on-chip)
            ],
        ),
        compiler_params=pltpu.CompilerParams(
            # Row axis must stay serial: phase 1 reads z tiles from all row tiles out of
            # per-core scratch (see module docstring).  Reduction axis is last.
            dimension_semantics=("arbitrary", "arbitrary", "arbitrary"),
            vmem_limit_bytes=32 * 1024 * 1024,   # fits v7x's 64 MiB physical with headroom
        ),
    )(a_pad, x_pad, w1_pad, w2_pad, b_stack)

    return out_pad[:n, :n_cls]


def init_params(key, num_features, hidden_channels, num_classes):
    """Deterministic synthetic init (GCNConv: one weight + one bias per layer)."""
    ks = jax.random.split(key, 4)

    def glorot(k, fan_in, fan_out):
        scale = jnp.sqrt(6.0 / (fan_in + fan_out))
        return jax.random.uniform(k, (fan_in, fan_out), jnp.float32, -scale, scale)

    return {
        "w1": glorot(ks[0], num_features, hidden_channels),
        "b1": 0.5 * jax.random.normal(ks[1], (hidden_channels,), jnp.float32),
        "w2": glorot(ks[2], hidden_channels, num_classes),
        "b2": 0.5 * jax.random.normal(ks[3], (num_classes,), jnp.float32),
    }


# ----------------------------------------------------------------------------------- #
if __name__ == "__main__":
    num_nodes = 16
    num_features = 8
    hidden_channels = 32
    num_classes = 4

    key = jax.random.PRNGKey(0)
    k_x, k_e, k_p = jax.random.split(key, 3)

    x = jax.random.normal(k_x, (num_nodes, num_features), dtype=jnp.float32)

    num_edges = 40
    edge_index = jax.random.randint(
        k_e, (2, num_edges), minval=0, maxval=num_nodes, dtype=jnp.int32
    )

    params = init_params(k_p, num_features, hidden_channels, num_classes)

    out = jax.block_until_ready(simple_gcn_forward(x, edge_index, params))

    # Matched-precision pure-JAX reference: same GCN math, same bf16 feed of the two
    # N^2 adjacency matmuls (f32 accumulation), projections / bias / relu in f32.
    a = build_gcn_adjacency(edge_index, num_nodes)
    a16, x16 = a.astype(jnp.bfloat16), x.astype(jnp.bfloat16)
    agg = jnp.dot(a16, x16, preferred_element_type=jnp.float32)
    h_ref = jnp.maximum(agg @ params["w1"] + params["b1"], 0.0)
    z_ref = (h_ref @ params["w2"]).astype(jnp.bfloat16)
    out_ref = jnp.dot(a16, z_ref, preferred_element_type=jnp.float32) + params["b2"]

    assert out.shape == (num_nodes, num_classes)
    max_err = float(jnp.max(jnp.abs(out - out_ref)))
    assert jnp.allclose(out, out_ref, atol=3e-2, rtol=3e-2), max_err

    print("KERNEL_OK")
</pallas_src>

<mosaic_0001>
module attributes {stable_mosaic.version = 11 : i64} {
  func.func @_fused_gcn_kernel(%arg0: i32, %arg1: i32, %arg2: i32, %arg3: memref<128x128xbf16, #tpu.memory_space<vmem>>, %arg4: memref<128x128xbf16, #tpu.memory_space<vmem>>, %arg5: memref<128x128xf32, #tpu.memory_space<vmem>>, %arg6: memref<128x128xf32, #tpu.memory_space<vmem>>, %arg7: memref<2x128xf32, #tpu.memory_space<vmem>>, %arg8: memref<128x128xf32, #tpu.memory_space<vmem>>, %arg9: memref<128x128xf32, #tpu.memory_space<vmem>>, %arg10: memref<128x128xf32, #tpu.memory_space<vmem>>, %arg11: memref<1x128x128xbf16, #tpu.memory_space<vmem>>) attributes {dimension_semantics = [#tpu.dimension_semantics<arbitrary>, #tpu.dimension_semantics<arbitrary>, #tpu.dimension_semantics<arbitrary>], iteration_bounds = array<i64: 2, 1, 1>, scalar_prefetch = 0 : i64, scratch_operands = 3 : i64, tpu.core_type = #tpu.core_type<tc>, window_params = [{transform_indices = @transform_0, window_bounds = array<i64: 128, 128>}, {transform_indices = @transform_1, window_bounds = array<i64: 128, 128>}, {pipeline_mode = #tpu.pipeline_mode<synchronous>, transform_indices = @transform_2, window_bounds = array<i64: 128, 128>}, {pipeline_mode = #tpu.pipeline_mode<synchronous>, transform_indices = @transform_3, window_bounds = array<i64: 128, 128>}, {pipeline_mode = #tpu.pipeline_mode<synchronous>, transform_indices = @transform_4, window_bounds = array<i64: 2, 128>}, {transform_indices = @transform_5, window_bounds = array<i64: 128, 128>}]} {
    %c0_i32 = arith.constant 0 : i32
    %0 = arith.cmpi eq, %arg0, %c0_i32 : i32
    %1 = arith.extui %0 : i1 to i32
    %c0_i32_0 = arith.constant 0 : i32
    %2 = arith.cmpi ne, %1, %c0_i32_0 : i32
    scf.if %2 {
      %c0_i32_2 = arith.constant 0 : i32
      %6 = arith.cmpi eq, %arg2, %c0_i32_2 : i32
      %7 = arith.extui %6 : i1 to i32
      %c0_i32_3 = arith.constant 0 : i32
      %8 = arith.cmpi ne, %7, %c0_i32_3 : i32
      scf.if %8 {
        %cst_13 = arith.constant 0.000000e+00 : f32
        %18 = vector.broadcast %cst_13 : f32 to vector<128x128xf32>
        %c0_14 = arith.constant 0 : index
        %c0_15 = arith.constant 0 : index
        %19 = vector.load %arg9[%c0_14, %c0_15] : memref<128x128xf32, #tpu.memory_space<vmem>>, vector<128x128xf32>
        tpu.vector_store %arg9[%c0_14, %c0_15], %18 {strides = array<i32>} : memref<128x128xf32, #tpu.memory_space<vmem>>, vector<128x128xf32>,
      } else {
      }
      %c0 = arith.constant 0 : index
      %c0_4 = arith.constant 0 : index
      %9 = vector.load %arg9[%c0, %c0_4] : memref<128x128xf32, #tpu.memory_space<vmem>>, vector<128x128xf32>
      %c0_5 = arith.constant 0 : index
      %c0_6 = arith.constant 0 : index
      %10 = vector.load %arg3[%c0_5, %c0_6] : memref<128x128xbf16, #tpu.memory_space<vmem>>, vector<128x128xbf16>
      %c0_7 = arith.constant 0 : index
      %c0_8 = arith.constant 0 : index
      %11 = vector.load %arg4[%c0_7, %c0_8] : memref<128x128xbf16, #tpu.memory_space<vmem>>, vector<128x128xbf16>
      %cst = arith.constant dense<0.000000e+00> : vector<128x128xf32>
      %12 = tpu.matmul %10, %11, %cst {dimension_numbers = #tpu.dot_dimension_numbers<[1], [0], [0], [1], [0, 0, 1, 1], [], []>} : vector<128x128xbf16>, vector<128x128xbf16>, vector<128x128xf32> -> vector<128x128xf32>
      %13 = arith.addf %9, %12 : vector<128x128xf32>
      %c0_9 = arith.constant 0 : index
      %c0_10 = arith.constant 0 : index
      %14 = vector.load %arg9[%c0_9, %c0_10] : memref<128x128xf32, #tpu.memory_space<vmem>>, vector<128x128xf32>
      tpu.vector_store %arg9[%c0_9, %c0_10], %13 {strides = array<i32>} : memref<128x128xf32, #tpu.memory_space<vmem>>, vector<128x128xf32>,
      %c0_i32_11 = arith.constant 0 : i32
      %15 = arith.cmpi eq, %arg2, %c0_i32_11 : i32
      %16 = arith.extui %15 : i1 to i32
      %c0_i32_12 = arith.constant 0 : i32
      %17 = arith.cmpi ne, %16, %c0_i32_12 : i32
      scf.if %17 {
        %c0_13 = arith.constant 0 : index
        %c0_14 = arith.constant 0 : index
        %18 = vector.load %arg9[%c0_13, %c0_14] : memref<128x128xf32, #tpu.memory_space<vmem>>, vector<128x128xf32>
        %c0_15 = arith.constant 0 : index
        %c0_16 = arith.constant 0 : index
        %19 = vector.load %arg5[%c0_15, %c0_16] : memref<128x128xf32, #tpu.memory_space<vmem>>, vector<128x128xf32>
        %cst_17 = arith.constant dense<0.000000e+00> : vector<128x128xf32>
        %20 = tpu.matmul %18, %19, %cst_17 {dimension_numbers = #tpu.dot_dimension_numbers<[1], [0], [0], [1], [0, 0, 1, 1], [], []>} : vector<128x128xf32>, vector<128x128xf32>, vector<128x128xf32> -> vector<128x128xf32>
        %c0_18 = arith.constant 0 : index
        %c0_19 = arith.constant 0 : index
        %21 = vector.load %arg7[%c0_18, %c0_19] : memref<2x128xf32, #tpu.memory_space<vmem>>, vector<1x128xf32>
        %22 = vector.broadcast %21 : vector<1x128xf32> to vector<128x128xf32>
        %23 = arith.addf %20, %22 : vector<128x128xf32>
        %cst_20 = arith.constant 0.000000e+00 : f32
        %24 = vector.broadcast %cst_20 : f32 to vector<128x128xf32>
        %25 = arith.maximumf %23, %24 : vector<128x128xf32>
        %c0_21 = arith.constant 0 : index
        %c0_22 = arith.constant 0 : index
        %26 = vector.load %arg6[%c0_21, %c0_22] : memref<128x128xf32, #tpu.memory_space<vmem>>, vector<128x128xf32>
        %cst_23 = arith.constant dense<0.000000e+00> : vector<128x128xf32>
        %27 = tpu.matmul %25, %26, %cst_23 {dimension_numbers = #tpu.dot_dimension_numbers<[1], [0], [0], [1], [0, 0, 1, 1], [], []>} : vector<128x128xf32>, vector<128x128xf32>, vector<128x128xf32> -> vector<128x128xf32>
        %28 = arith.truncf %27 : vector<128x128xf32> to vector<128x128xbf16>
        %29 = arith.index_cast %arg1 : i32 to index
        %c0_24 = arith.constant 0 : index
        %c0_25 = arith.constant 0 : index
        %30 = vector.load %arg11[%29, %c0_24, %c0_25] : memref<1x128x128xbf16, #tpu.memory_space<vmem>>, vector<1x128x128xbf16>
        %31 = vector.shape_cast %30 : vector<1x128x128xbf16> to vector<128x128xbf16>
        %32 = vector.shape_cast %28 : vector<128x128xbf16> to vector<1x128x128xbf16>
        tpu.vector_store %arg11[%29, %c0_24, %c0_25], %32 {strides = array<i32>} : memref<1x128x128xbf16, #tpu.memory_space<vmem>>, vector<1x128x128xbf16>,
      } else {
      }
    } else {
    }
    %c1_i32 = arith.constant 1 : i32
    %3 = arith.cmpi eq, %arg0, %c1_i32 : i32
    %4 = arith.extui %3 : i1 to i32
    %c0_i32_1 = arith.constant 0 : i32
    %5 = arith.cmpi ne, %4, %c0_i32_1 : i32
    scf.if %5 {
      %c0_i32_2 = arith.constant 0 : i32
      %6 = arith.cmpi eq, %arg2, %c0_i32_2 : i32
      %7 = arith.extui %6 : i1 to i32
      %c0_i32_3 = arith.constant 0 : i32
      %8 = arith.cmpi ne, %7, %c0_i32_3 : i32
      scf.if %8 {
        %c1 = arith.constant 1 : index
        %c0_13 = arith.constant 0 : index
        %20 = vector.load %arg7[%c1, %c0_13] : memref<2x128xf32, #tpu.memory_space<vmem>>, vector<1x128xf32>
        %21 = vector.shape_cast %20 : vector<1x128xf32> to vector<1x128xf32>
        %22 = vector.broadcast %21 : vector<1x128xf32> to vector<128x128xf32>
        %c0_14 = arith.constant 0 : index
        %c0_15 = arith.constant 0 : index
        %23 = vector.load %arg10[%c0_14, %c0_15] : memref<128x128xf32, #tpu.memory_space<vmem>>, vector<128x128xf32>
        tpu.vector_store %arg10[%c0_14, %c0_15], %22 {strides = array<i32>} : memref<128x128xf32, #tpu.memory_space<vmem>>, vector<128x128xf32>,
      } else {
      }
      %c0 = arith.constant 0 : index
      %c0_4 = arith.constant 0 : index
      %9 = vector.load %arg10[%c0, %c0_4] : memref<128x128xf32, #tpu.memory_space<vmem>>, vector<128x128xf32>
      %c0_5 = arith.constant 0 : index
      %c0_6 = arith.constant 0 : index
      %10 = vector.load %arg3[%c0_5, %c0_6] : memref<128x128xbf16, #tpu.memory_space<vmem>>, vector<128x128xbf16>
      %11 = arith.index_cast %arg2 : i32 to index
      %c0_7 = arith.constant 0 : index
      %c0_8 = arith.constant 0 : index
      %12 = vector.load %arg11[%11, %c0_7, %c0_8] : memref<1x128x128xbf16, #tpu.memory_space<vmem>>, vector<1x128x128xbf16>
      %13 = vector.shape_cast %12 : vector<1x128x128xbf16> to vector<128x128xbf16>
      %cst = arith.constant dense<0.000000e+00> : vector<128x128xf32>
      %14 = tpu.matmul %10, %13, %cst {dimension_numbers = #tpu.dot_dimension_numbers<[1], [0], [0], [1], [0, 0, 1, 1], [], []>} : vector<128x128xbf16>, vector<128x128xbf16>, vector<128x128xf32> -> vector<128x128xf32>
      %15 = arith.addf %9, %14 : vector<128x128xf32>
      %c0_9 = arith.constant 0 : index
      %c0_10 = arith.constant 0 : index
      %16 = vector.load %arg10[%c0_9, %c0_10] : memref<128x128xf32, #tpu.memory_space<vmem>>, vector<128x128xf32>
      tpu.vector_store %arg10[%c0_9, %c0_10], %15 {strides = array<i32>} : memref<128x128xf32, #tpu.memory_space<vmem>>, vector<128x128xf32>,
      %c0_i32_11 = arith.constant 0 : i32
      %17 = arith.cmpi eq, %arg2, %c0_i32_11 : i32
      %18 = arith.extui %17 : i1 to i32
      %c0_i32_12 = arith.constant 0 : i32
      %19 = arith.cmpi ne, %18, %c0_i32_12 : i32
      scf.if %19 {
        %c0_13 = arith.constant 0 : index
        %c0_14 = arith.constant 0 : index
        %20 = vector.load %arg10[%c0_13, %c0_14] : memref<128x128xf32, #tpu.memory_space<vmem>>, vector<128x128xf32>
        %c0_15 = arith.constant 0 : index
        %c0_16 = arith.constant 0 : index
        %21 = vector.load %arg8[%c0_15, %c0_16] : memref<128x128xf32, #tpu.memory_space<vmem>>, vector<128x128xf32>
        tpu.vector_store %arg8[%c0_15, %c0_16], %20 {strides = array<i32>} : memref<128x128xf32, #tpu.memory_space<vmem>>, vector<128x128xf32>,
      } else {
      }
    } else {
    }
    return
  }
  func.func @transform_0(%arg0: i32, %arg1: i32, %arg2: i32) -> (i32, i32) {
    %c0_i32 = arith.constant 0 : i32
    return %arg1, %arg2 : i32, i32
  }
  func.func @transform_1(%arg0: i32, %arg1: i32, %arg2: i32) -> (i32, i32) {
    %c1_i32 = arith.constant 1 : i32
    %0 = arith.subi %c1_i32, %arg0 : i32
    %1 = arith.muli %arg2, %0 : i32
    %c0_i32 = arith.constant 0 : i32
    %c0_i32_0 = arith.constant 0 : i32
    return %1, %c0_i32 : i32, i32
  }
  func.func @transform_2(%arg0: i32, %arg1: i32, %arg2: i32) -> (i32, i32) {
    %c0_i32 = arith.constant 0 : i32
    %c0_i32_0 = arith.constant 0 : i32
    %c0_i32_1 = arith.constant 0 : i32
    return %c0_i32, %c0_i32_0 : i32, i32
  }
  func.func @transform_3(%arg0: i32, %arg1: i32, %arg2: i32) -> (i32, i32) {
    %c0_i32 = arith.constant 0 : i32
    %c0_i32_0 = arith.constant 0 : i32
    %c0_i32_1 = arith.constant 0 : i32
    return %c0_i32, %c0_i32_0 : i32, i32
  }
  func.func @transform_4(%arg0: i32, %arg1: i32, %arg2: i32) -> (i32, i32) {
    %c0_i32 = arith.constant 0 : i32
    %c0_i32_0 = arith.constant 0 : i32
    %c0_i32_1 = arith.constant 0 : i32
    return %c0_i32, %c0_i32_0 : i32, i32
  }
  func.func @transform_5(%arg0: i32, %arg1: i32, %arg2: i32) -> (i32, i32) {
    %0 = arith.muli %arg1, %arg0 : i32
    %c0_i32 = arith.constant 0 : i32
    %c0_i32_0 = arith.constant 0 : i32
    return %0, %c0_i32 : i32, i32
  }
}

</mosaic_0001>

<bundles_post_ra>
// kernel: tpu_custom_call.1
= control target key start
LH: loop header
LB: loop body
LE: loop exit
PB: predicated region body
PF: predicated region fallthrough
CT: control target
= control target key end

     0   :  { %10 = vsyncpa [#allocation6], 0  ;;  %s2373_s0 = inlined_call_operand.hbm [shape: bf16[128,128], index: 0, kind: input, shape index: {}]   ;;  %s2374_s1 = inlined_call_operand.hbm [shape: bf16[128,128], index: 1, kind: input, shape index: {}]   ;;  %s2375_s2 = inlined_call_operand.hbm [shape: f32[128,128], index: 2, kind: input, shape index: {}]   ;;  %s2376_s3 = inlined_call_operand.hbm [shape: f32[128,128], index: 3, kind: input, shape index: {}]   ;;  %s2377_s4 = inlined_call_operand.vmem [shape: f32[2,128], index: 4, kind: input, shape index: {}]   ;;  %s2378_s5 = inlined_call_operand.hbm [shape: f32[128,128], index: 5, kind: output, shape index: {}]  }
   0x1   :  { %11 = vsyncpa [#allocation9], 0 }
   0x2   :  { %13 = vsyncpa [#allocation9 + $0x1], 0 }
   0x3   :  { %14 = vsyncpa [#allocation12], 0 }
   0x4   :  { %15 = vsyncpa [#allocation7], 0 }
   0x5   :  { %17 = vsyncpa [#allocation7 + $0x1], 0  ;;  %s2177_s18 = smov 0   ;;  %s2179_s19 = smov 0  }
   0x6   :  { %s2181_s20 = smov 0  }
   0x7 LB: > { %s2136_s21 = smov [#allocation10]   ;;  %s2193_s23 = sadd.s32 4294967295, %s2134_s20   ;;  %s2134_s20 = sphi %s2181_s20, %s23_s20   ;;  %s2130_s19 = sphi %s2179_s19, %s2398_s19   ;;  %s2126_s18 = sphi %s2177_s18, %s2397_s18  }
   0x8   : > { %s225_s22 = sshll.u32 %s2136_s21, 4  ;;  %s1433_s24 = sadd.s32 4294967294, %s2134_s20   ;;  %s226_s22 = int_to_ptr.vmem [resolvable:$true] %s225_s22 }
   0x9   : > { %p1434_p0 = scmp.ge.s32.totalorder %s2134_s20, 1  ;;  %p196_p1 = scmp.lt.s32.totalorder %s2134_s20, 3 }
   0xa   : > { %p2379_p2 = scmp.eq.s32.totalorder %s2193_s23, 0  ;;  %s42_s27 = sadd.s32 1, %s2130_s19 }
   0xb   : > { %p2199_p3 = pnand %p1434_p0, %p196_p1  ;;  %s1954_s30 = scalar_lea.hbm %s2375_s2, 2048 }
   0xc   : > { %p1955_p7 = scmp.ne.s32.totalorder %s2375_s2, %s1954_s30  ;;  %p1961_p11 = scmp.lt.u32.totalorder %s1954_s30, %s2375_s2 }
   0xd   : > { %s2381_s25 = scalar_select %p2199_p3, 1, 0 }
   0xe   : > { %p1865_p4 = pneg %p2199_p3 }
  0x10   : > { %p2208_p6 = pnand %p2379_p2, %p1865_p4 }
  0x12   : > { %p2221_p8 = pneg %p2208_p6 }
  0x14   : > { %p1957_p9 = pnand %p2221_p8, %p1955_p7 }
  0x16   : > { %p1958_p10 = pneg %p1957_p9 }
  0x18   : > { %p1963_p12 = pnand %p1961_p11, %p1958_p10 }
  0x1a   : > { %1966 = shalt.err (!%p1963_p12)
}
  0x1b   : > { %s1967_s11 = scalar_lea.vmem %s226_s22, 2048  ;;  %p1975_p4 = scmp.lt.s32.totalorder %s226_s22, %s226_s22 }
  0x1c   : > { %p1968_p13 = scmp.ne.s32.totalorder %s226_s22, %s1967_s11  ;;  %p1976_p5 = scmp.lt.s32.totalorder %s1967_s11, %s1967_s11 }
  0x1e   : > { %p1970_p0 = pnand %p1968_p13, %p2221_p8  ;;  %p1977_p2 = por %p1976_p5, %p1975_p4 }
  0x20   : > { %p1971_p1 = pneg %p1970_p0 }
  0x22   : > { %p1978_p3 = pnand %p1977_p2, %p1971_p1 }
  0x24   : > { %1981 = shalt.err (!%p1978_p3)
}
  0x25   : > { %s2137_s12 = smov 128   ;;  %s2138_s13 = smov 8  }
  0x26   : > { %1871 = dma.hbm_to_vmem [thread:$0]  (!%p2208_p6), %s2375_s2, 2048, %s226_s22, [#allocation9], %s2137_s12, %s2137_s12, %s2138_s13  }
  0x27   : > { %p44_p7 = scmp.ge.s32.totalorder %s42_s27, 2  ;;  %s2139_s16 = smov [#allocation5]  }
  0x28   : > { %s212_s17 = sshll.u32 %s2139_s16, 4  ;;  %s1982_s29 = scalar_lea.hbm %s2373_s0, 1024  ;;  %s213_s17 = int_to_ptr.vmem [resolvable:$true] %s212_s17 }
  0x29   : > { %s2400_s27 = smov (%p44_p7, %s42_s27), 0  ;;  %p1983_p2 = scmp.ne.s32.totalorder %s2373_s0, %s1982_s29 }
  0x2a   : > { %p1989_p9 = scmp.lt.u32.totalorder %s1982_s29, %s2373_s0 }
  0x2b   : > { %p1985_p3 = pnand %p1983_p2, %p2221_p8 }
  0x2d   : > { %p1986_p5 = pneg %p1985_p3 }
  0x2f   : > { %p1991_p10 = pnand %p1989_p9, %p1986_p5 }
  0x31   : > { %1994 = shalt.err (!%p1991_p10)
}
  0x32   : > { %s1995_s22 = scalar_lea.vmem %s213_s17, 1024  ;;  %p2003_p0 = scmp.lt.s32.totalorder %s213_s17, %s213_s17 }
  0x33   : > { %p1996_p11 = scmp.ne.s32.totalorder %s213_s17, %s1995_s22  ;;  %p2004_p1 = scmp.lt.s32.totalorder %s1995_s22, %s1995_s22 }
  0x35   : > { %p1998_p12 = pnand %p1996_p11, %p2221_p8  ;;  %p2005_p4 = por %p2004_p1, %p2003_p0 }
  0x37   : > { %p1999_p13 = pneg %p1998_p12 }
  0x39   : > { %p2006_p7 = pnand %p2005_p4, %p1999_p13 }
  0x3b   : > { %2009 = shalt.err (!%p2006_p7)
}
  0x3c   : > { %s2140_s10 = smov 64   ;;  %s2141_s11 = smov 4  }
  0x3d   : > { %1868 = dma.hbm_to_vmem [thread:$0]  (!%p2208_p6), %s2373_s0, 1024, %s213_s17, [#allocation6], %s2140_s10, %s2140_s10, %s2141_s11  }
  0x3e   : > { %s2142_s16 = smov [#allocation11]   ;;  %s255_s28 = sand.u32 1, %s2134_s20  }
  0x3f   : > { %s238_s21 = sshll.u32 %s2142_s16, 4  ;;  %s2010_s6 = scalar_lea.hbm %s2376_s3, 2048  ;;  %s239_s21 = int_to_ptr.vmem [resolvable:$true] %s238_s21 }
  0x40   : > { %p2011_p5 = scmp.ne.s32.totalorder %s2376_s3, %s2010_s6  ;;  %p2017_p11 = scmp.lt.u32.totalorder %s2010_s6, %s2376_s3 }
  0x42   : > { %p2013_p9 = pnand %p2011_p5, %p2221_p8 }
  0x44   : > { %p2014_p10 = pneg %p2013_p9 }
  0x46   : > { %p2019_p12 = pnand %p2017_p11, %p2014_p10 }
  0x48   : > { %2022 = shalt.err (!%p2019_p12)
}
  0x49   : > { %s2023_s17 = scalar_lea.vmem %s239_s21, 2048  ;;  %p2031_p4 = scmp.lt.s32.totalorder %s239_s21, %s239_s21 }
  0x4a   : > { %p2024_p13 = scmp.ne.s32.totalorder %s239_s21, %s2023_s17  ;;  %p2032_p7 = scmp.lt.s32.totalorder %s2023_s17, %s2023_s17 }
  0x4c   : > { %p2026_p0 = pnand %p2024_p13, %p2221_p8  ;;  %p2033_p3 = por %p2032_p7, %p2031_p4 }
  0x4e   : > { %p2027_p1 = pneg %p2026_p0 }
  0x50   : > { %p2034_p2 = pnand %p2033_p3, %p2027_p1 }
  0x52   : > { %2037 = shalt.err (!%p2034_p2)
}
  0x53   : > { %1874 = dma.hbm_to_vmem [thread:$0]  (!%p2208_p6), %s2376_s3, 2048, %s239_s21, [#allocation12], %s2137_s12, %s2137_s12, %s2138_s13  }
  0x54   : > { %s2143_s29 = smov [#allocation8]   ;;  %p2384_p8 = scmp.lt.s32.totalorder %s2134_s20, 2 }
  0x55   : > { %s268_s8 = sshll.u32 %s2143_s29, 4  ;;  %p2385_p5 = scmp.eq.s32.totalorder %s2134_s20, 0  ;;  %s269_s8 = int_to_ptr.vmem [resolvable:$true] %s268_s8 }
  0x56   : > { %s256_s26 = scalar_lea.sflag [#allocation9], %s255_s28  ;;  %s2038_s9 = scalar_lea.hbm %s2374_s1, 1024 }
  0x57   : > { %p2291_p9 = pnand %p2385_p5, %p2384_p8  ;;  %p2039_p2 = scmp.ne.s32.totalorder %s2374_s1, %s2038_s9 }
  0x58   : > { %p2045_p11 = scmp.lt.u32.totalorder %s2038_s9, %s2374_s1 }
  0x59   : > { %p2040_p6 = pneg %p2291_p9 }
  0x5b   : > { %p2041_p3 = pnand %p2040_p6, %p2039_p2 }
  0x5d   : > { %p2042_p10 = pneg %p2041_p3 }
  0x5f   : > { %p2047_p12 = pnand %p2045_p11, %p2042_p10 }
  0x61   : > { %2050 = shalt.err (!%p2047_p12)
}
  0x62   : > { %s2051_s21 = scalar_lea.vmem %s269_s8, 1024  ;;  %s2058_s28 = scalar_lea.vmem %s269_s8, 2048 }
  0x63   : > { %p2052_p13 = scmp.ne.s32.totalorder %s269_s8, %s2051_s21  ;;  %p2059_p4 = scmp.lt.s32.totalorder %s269_s8, %s269_s8 }
  0x64   : > { %p2060_p7 = scmp.lt.s32.totalorder %s2058_s28, %s2051_s21 }
  0x65   : > { %p2054_p0 = pnand %p2052_p13, %p2040_p6 }
  0x66   : > { %p2061_p8 = por %p2060_p7, %p2059_p4 }
  0x67   : > { %p2055_p1 = pneg %p2054_p0 }
  0x69   : > { %p2062_p5 = pnand %p2061_p8, %p2055_p1 }
  0x6b   : > { %2065 = shalt.err (!%p2062_p5)
}
  0x6c   : > { %1878 = dma.hbm_to_vmem [thread:$0]  (!%p2291_p9), %s2374_s1, 1024, %s269_s8, %s256_s26, %s2140_s10, %s2140_s10, %s2141_s11  }
  0x6d   : > { %p2387_p2 = scmp.ne.s32.totalorder %s2381_s25, 0 }
  0x6e   : > { %p2388_p6 = scmp.eq.s32.totalorder (!%p2387_p2), %s2193_s23, 0 }
  0x6f   : > { %280 = sbr.rel (%p2387_p2) target bundleno = 1124 (0x464), region = 40 }
  0x76   : > { %2105 = dma.done.wait (%p2388_p6), [#allocation6], 1024   ;;  %p2389_p3 = pmov %p2388_p6 }
  0x77   : > { %s286_s16 = sand.u32 1, %s2193_s23  }
  0x78   : > { %2107 = vsyncadd (%p2389_p3), [#allocation6], 4294966272  ;;  %s287_s29 = scalar_lea.sflag [#allocation9], %s286_s16  ;;  %p2390_p10 = pmov %p2389_p3 }
  0x79   : > { %p2391_p11 = pmov %p2389_p3 }
  0x7a   : > { %2109 = dma.done.wait (%p2390_p10), %s287_s29, 1024  }
  0x7b   : > { %2111 = vsyncadd (%p2391_p11), %s287_s29, 4294966272  ;;  %p2392_p9 = pmov %p2389_p3 }
  0x7c   : > { %p2393_p12 = pmov %p2389_p3 }
  0x7d   : > { %2113 = dma.done.wait (%p2392_p9), [#allocation9], 2048  }
  0x7e   : > { %2115 = vsyncadd (%p2393_p12), [#allocation9], 4294965248  ;;  %p2394_p13 = pmov %p2389_p3 }
  0x7f   : > { %p2395_p0 = pmov %p2389_p3 }
  0x80   : > { %2117 = dma.done.wait (%p2394_p13), [#allocation12], 2048  }
  0x81   : > { %2119 = vsyncadd (%p2395_p0), [#allocation12], 4294965248  ;;  %p1445_p1 = scmp.ne.s32.totalorder %s2126_s18, 0 }
  0x82   : > { %v1930_v0 = vld [vmem:[#allocation8] sm:$0xff] (!%p1445_p1)   ;;  %v1931_v1 = vld [vmem:[#allocation8 + $0x8] sm:$0xff] (!%p1445_p1)   ;;  %v1932_v2 = vld [vmem:[#allocation8 + $0x10] sm:$0xff] (!%p1445_p1)  }
  0x83   : > { %335 = sbr.rel (%p1445_p1) target bundleno = 840 (0x348), region = 60  ;;  %1573 = vmatprep.subr.bf16.mxu0 (!%p1445_p1), %v1930_v0  ;;  %v1933_v3 = vld [vmem:[#allocation8 + $0x18] sm:$0xff] (!%p1445_p1)   ;;  %v1938_v4 = vld [vmem:[#allocation5] sm:$0xff] (!%p1445_p1)   ;;  %v1935_v6 = vld [vmem:[#allocation8 + $0x28] sm:$0xff] (!%p1445_p1)  }
  0x84   : > { %1574 = vmatpush3.bf16.msra.mxu0 (!%p1445_p1), %v1930_v0  ;;  %1589 = vmatprep.mubr.bf16.mxu0 (!%p1445_p1), %v1938_v4  ;;  %v1934_v5 = vld [vmem:[#allocation8 + $0x20] sm:$0xff] (!%p1445_p1)   ;;  %v649_v8 = vld [vmem:[#allocation10 + $0x8] sm:$0xff] (!%p1445_p1)  ;;  %v650_v9 = vld [vmem:[#allocation10 + $0x10] sm:$0xff] (!%p1445_p1) }
  0x85   : > { %1575 = vmatprep.subr.bf16.mxu0 (!%p1445_p1), %v1931_v1  ;;  %v648_v7 = vld [vmem:[#allocation10] sm:$0xff] (!%p1445_p1)  ;;  %v651_v11 = vld [vmem:[#allocation10 + $0x18] sm:$0xff] (!%p1445_p1)  ;;  %v653_v14 = vld [vmem:[#allocation10 + $0x28] sm:$0xff] (!%p1445_p1) }
  0x86   : > { %v1749_v10 = vpack.c.bf16 (!%p1445_p1), %v649_v8, %v648_v7  ;;  %v1753_v12 = vpack.c.bf16 (!%p1445_p1), %v651_v11, %v650_v9  ;;  %v652_v13 = vld [vmem:[#allocation10 + $0x20] sm:$0xff] (!%p1445_p1)  ;;  %v1936_v15 = vld [vmem:[#allocation8 + $0x30] sm:$0xff] (!%p1445_p1)   ;;  %v655_v18 = vld [vmem:[#allocation10 + $0x38] sm:$0xff] (!%p1445_p1) }
  0x87   : > { %v1757_v16 = vpack.c.bf16 (!%p1445_p1), %v653_v14, %v652_v13  ;;  %v654_v17 = vld [vmem:[#allocation10 + $0x30] sm:$0xff] (!%p1445_p1)  ;;  %v1937_v19 = vld [vmem:[#allocation8 + $0x38] sm:$0xff] (!%p1445_p1)   ;;  %v656_v21 = vld [vmem:[#allocation10 + $0x40] sm:$0xff] (!%p1445_p1) }
  0x88   : > { %1576 = vmatpush3.bf16.msra.mxu0 (!%p1445_p1), %v1931_v1  ;;  %1750 = vmatprep.subr.bf16.mxu1 (!%p1445_p1), %v1749_v10  ;;  %v1761_v20 = vpack.c.bf16 (!%p1445_p1), %v655_v18, %v654_v17  ;;  %v657_v22 = vld [vmem:[#allocation10 + $0x48] sm:$0xff] (!%p1445_p1)  ;;  %v658_v25 = vld [vmem:[#allocation10 + $0x50] sm:$0xff] (!%p1445_p1)  ;;  %v659_v26 = vld [vmem:[#allocation10 + $0x58] sm:$0xff] (!%p1445_p1) }
  0x89   : > { %1577 = vmatprep.subr.bf16.mxu0 (!%p1445_p1), %v1932_v2  ;;  %1752 = vmatpush3.bf16.msra.mxu1 (!%p1445_p1), %v1749_v10  ;;  %v1765_v23 = vpack.c.bf16 (!%p1445_p1), %v657_v22, %v656_v21  ;;  %v1939_v24 = vld [vmem:[#allocation5 + $0x8] sm:$0xff] (!%p1445_p1)   ;;  %v1940_v27 = vld [vmem:[#allocation5 + $0x10] sm:$0xff] (!%p1445_p1)   ;;  %v1769_v28 = vpack.c.bf16 (!%p1445_p1), %v659_v26, %v658_v25  ;;  %v660_v29 = vld [vmem:[#allocation10 + $0x60] sm:$0xff] (!%p1445_p1) }
  0x8a   : > { %1754 = vmatprep.subr.bf16.mxu1 %v1753_v12  ;;  %v661_v30 = vld [vmem:[#allocation10 + $0x68] sm:$0xff]  ;;  %v1941_v32 = vld [vmem:[#allocation5 + $0x18] sm:$0xff]   ;;  %v1942_v33 = vld [vmem:[#allocation5 + $0x20] sm:$0xff]  }
  0x8b   : > { %v1773_v31 = vpack.c.bf16 %v661_v30, %v660_v29  ;;  %v1943_v34 = vld [vmem:[#allocation5 + $0x28] sm:$0xff]   ;;  %v1944_v35 = vld [vmem:[#allocation5 + $0x30] sm:$0xff]   ;;  %v1945_v36 = vld [vmem:[#allocation5 + $0x38] sm:$0xff]  }
  0x8c   : > { %1578 = vmatpush3.bf16.msra.mxu0 %v1932_v2  ;;  %v662_v37 = vld [vmem:[#allocation10 + $0x70] sm:$0xff]  ;;  %v663_v38 = vld [vmem:[#allocation10 + $0x78] sm:$0xff]  ;;  %v830_v40 = vld [vmem:[#allocation11] sm:$0xff] }
  0x8d   : > { %1579 = vmatprep.subr.bf16.mxu0 %v1933_v3  ;;  %1756 = vmatpush3.bf16.msra.mxu1 %v1753_v12  ;;  %v1777_v39 = vpack.c.bf16 %v663_v38, %v662_v37  ;;  %v831_v41 = vld [vmem:[#allocation11 + $0x8] sm:$0xff]  ;;  %v832_v42 = vld [vmem:[#allocation11 + $0x10] sm:$0xff]  ;;  %v833_v44 = vld [vmem:[#allocation11 + $0x18] sm:$0xff] }
  0x8e   : > { %1758 = vmatprep.subr.bf16.mxu1 %v1757_v16  ;;  %v1781_v43 = vpack.c.bf16 %v831_v41, %v830_v40  ;;  %v1785_v45 = vpack.c.bf16 %v833_v44, %v832_v42  ;;  %v834_v46 = vld [vmem:[#allocation11 + $0x20] sm:$0xff]  ;;  %v835_v47 = vld [vmem:[#allocation11 + $0x28] sm:$0xff]  ;;  %v836_v49 = vld [vmem:[#allocation11 + $0x30] sm:$0xff] }
  0x8f   : > { %v1789_v48 = vpack.c.bf16 %v835_v47, %v834_v46  ;;  %v837_v50 = vld [vmem:[#allocation11 + $0x38] sm:$0xff]  ;;  %v838_v52 = vld [vmem:[#allocation11 + $0x40] sm:$0xff]  ;;  %v839_v53 = vld [vmem:[#allocation11 + $0x48] sm:$0xff] }
  0x90   : > { %1580 = vmatpush3.bf16.msra.mxu0 %v1933_v3  ;;  %v1793_v51 = vpack.c.bf16 %v837_v50, %v836_v49  ;;  %v1797_v54 = vpack.c.bf16 %v839_v53, %v838_v52  ;;  %v840_v55 = vld [vmem:[#allocation11 + $0x50] sm:$0xff]  ;;  %v841_v56 = vld [vmem:[#allocation11 + $0x58] sm:$0xff]  ;;  %v842_v58 = vld [vmem:[#allocation11 + $0x60] sm:$0xff] }
  0x91   : > { %1581 = vmatprep.subr.bf16.mxu0 %v1934_v5  ;;  %1760 = vmatpush3.bf16.msra.mxu1 %v1757_v16  ;;  %v1801_v57 = vpack.c.bf16 %v841_v56, %v840_v55  ;;  %v843_v59 = vld [vmem:[#allocation11 + $0x68] sm:$0xff]  ;;  %v844_v13 = vld [vmem:[#allocation11 + $0x70] sm:$0xff]  ;;  %v845_v14 = vld [vmem:[#allocation11 + $0x78] sm:$0xff] }
  0x92   : > { %1762 = vmatprep.subr.bf16.mxu1 %v1761_v20  ;;  %v1805_v60 = vpack.c.bf16 %v843_v59, %v842_v58  ;;  %v1462_v16 = vld [vmem:[%s2377_s4] ss:$0 sm:$0xff] }
  0x94   : > { %1582 = vmatpush3.bf16.msra.mxu0 %v1934_v5 }
  0x95   : > { %1583 = vmatprep.subr.bf16.mxu0 %v1935_v6  ;;  %1764 = vmatpush3.bf16.msra.mxu1 %v1761_v20 }
  0x96   : > { %1766 = vmatprep.subr.bf16.mxu1 %v1765_v23 }
  0x98   : > { %1584 = vmatpush3.bf16.msra.mxu0 %v1935_v6 }
  0x99   : > { %1585 = vmatprep.subr.bf16.mxu0 %v1936_v15  ;;  %1768 = vmatpush3.bf16.msra.mxu1 %v1765_v23 }
  0x9a   : > { %1770 = vmatprep.subr.bf16.mxu1 %v1769_v28 }
  0x9c   : > { %1586 = vmatpush3.bf16.msra.mxu0 %v1936_v15  ;;  %v1809_v15 = vpack.c.bf16 %v845_v14, %v844_v13 }
  0x9d   : > { %1587 = vmatprep.subr.bf16.mxu0 %v1937_v19  ;;  %1772 = vmatpush3.bf16.msra.mxu1 %v1769_v28 }
  0x9e   : > { %1774 = vmatprep.subr.bf16.mxu1 %v1773_v31 }
  0xa0   : > { %1588 = vmatpush3.bf16.msra.mxu0 %v1937_v19 }
  0xa1   : > { %1776 = vmatpush3.bf16.msra.mxu1 %v1773_v31  ;;  %1782 = vmatprep.subr.bf16.mxu0 %v1781_v43 }
  0xa2   : > { %1778 = vmatprep.subr.bf16.mxu1 %v1777_v39 }
  0xa3   : > { %1590 = vmatmul.mubr.bf16.vlgmr.msra.gmra.mrb[0].mxu0 %v1939_v24 }
  0xa4   : > { %1593 = vmatprep.mubr.bf16.mxu0 %v1940_v27  ;;  %1784 = vmatpush3.bf16.msra.mxu0 %v1781_v43 }
  0xa5   : > { %1780 = vmatpush3.bf16.msra.mxu1 %v1777_v39  ;;  %1786 = vmatprep.subr.bf16.mxu0 %v1785_v45 }
  0xa6   : > { %1813 = vmatprep.subr.bf16.mxu1 %v1781_v43 }
  0xa8   : > { %1788 = vmatpush3.bf16.msra.mxu0 %v1785_v45 }
  0xa9   : > { %1790 = vmatprep.subr.bf16.mxu0 %v1789_v48 }
  0xab   : > { %1594 = vmatmul.mubr.bf16.gmra.mrb[4].mxu0 %v1941_v32 }
  0xac   : > { %1597 = vmatprep.mubr.bf16.mxu0 %v1942_v33  ;;  %1792 = vmatpush3.bf16.msra.mxu0 %v1789_v48 }
  0xad   : > { %1794 = vmatprep.subr.bf16.mxu0 %v1793_v51 }
  0xb0   : > { %1796 = vmatpush3.bf16.msra.mxu0 %v1793_v51 }
  0xb1   : > { %1798 = vmatprep.subr.bf16.mxu0 %v1797_v54 }
  0xb3   : > { %1598 = vmatmul.mubr.bf16.gmra.mrb[8].mxu0 %v1943_v34 }
  0xb4   : > { %1601 = vmatprep.mubr.bf16.mxu0 %v1944_v35  ;;  %1800 = vmatpush3.bf16.msra.mxu0 %v1797_v54 }
  0xb5   : > { %1802 = vmatprep.subr.bf16.mxu0 %v1801_v57 }
  0xb8   : > { %1804 = vmatpush3.bf16.msra.mxu0 %v1801_v57 }
  0xb9   : > { %1806 = vmatprep.subr.bf16.mxu0 %v1805_v60 }
  0xbb   : > { %1602 = vmatmul.mubr.bf16.gmra.mrb[12].mxu0 %v1945_v36 }
  0xbc   : > { %1808 = vmatpush3.bf16.msra.mxu0 %v1805_v60 }
  0xbd   : > { %1810 = vmatprep.subr.bf16.mxu0 %v1809_v15 }
  0xc0   : > { %1812 = vmatpush3.bf16.msra.mxu0 %v1809_v15 }
 0x176   : > { %v1591_v61 = vpop.f32.mrb[0].mxu0 }
 0x177   : > { %v534_v62 = vpop.f32.mrb[1].mxu0 }
 0x178   : > { %v1592_v63 = vpop.f32.mrb[2].mxu0  ;;  %1637 = vmatprep.mubr.f32.mxu1 %v534_v62 }
 0x179   : > { %v537_v0 = vpop.f32.mrb[3].mxu0 }
 0x17a   : > { %1638 = vmatmul.mubr.f32.vlgmr.msra.gmra.mrb[0].mxu1 %v537_v0 }
 0x17b   : > { %1640 = vmatprep.mubr.f32.mxu1 %v1591_v61  ;;  %1821 = vmatpush3.bf16.msra.mxu1 %v1781_v43 }
 0x17c   : > { %1814 = vmatprep.subr.bf16.mxu1 %v1785_v45 }
 0x17e   : > { %v1595_v1 = vpop.f32.mrb[4].mxu0  ;;  %1641 = vmatmul.mubr.f32.gmra.mrb[2].mxu1 %v1592_v63 }
 0x17f   : > { %v550_v2 = vpop.f32.mrb[5].mxu0  ;;  %1822 = vmatpush3.bf16.msra.mxu1 %v1785_v45 }
 0x180   : > { %v1596_v3 = vpop.f32.mrb[6].mxu0  ;;  %1643 = vmatprep.mubr.f32.mxu1 %v550_v2  ;;  %1815 = vmatprep.subr.bf16.mxu1 %v1789_v48 }
 0x181   : > { %v553_v4 = vpop.f32.mrb[7].mxu0 }
 0x182   : > { %1644 = vmatmul.mubr.f32.gmra.mrb[4].mxu1 %v553_v4 }
 0x183   : > { %1646 = vmatprep.mubr.f32.mxu1 %v1595_v1  ;;  %1823 = vmatpush3.bf16.msra.mxu1 %v1789_v48 }
 0x184   : > { %1816 = vmatprep.subr.bf16.mxu1 %v1793_v51 }
 0x186   : > { %v1599_v5 = vpop.f32.mrb[8].mxu0  ;;  %1647 = vmatmul.mubr.f32.gmra.mrb[6].mxu1 %v1596_v3 }
 0x187   : > { %v566_v6 = vpop.f32.mrb[9].mxu0  ;;  %1824 = vmatpush3.bf16.msra.mxu1 %v1793_v51 }
 0x188   : > { %v1600_v7 = vpop.f32.mrb[10].mxu0  ;;  %1649 = vmatprep.mubr.f32.mxu1 %v566_v6  ;;  %1817 = vmatprep.subr.bf16.mxu1 %v1797_v54 }
 0x189   : > { %v569_v8 = vpop.f32.mrb[11].mxu0 }
 0x18a   : > { %1650 = vmatmul.mubr.f32.gmra.mrb[8].mxu1 %v569_v8 }
 0x18b   : > { %1652 = vmatprep.mubr.f32.mxu1 %v1599_v5  ;;  %1825 = vmatpush3.bf16.msra.mxu1 %v1797_v54 }
 0x18c   : > { %1818 = vmatprep.subr.bf16.mxu1 %v1801_v57 }
 0x18e   : > { %v1603_v9 = vpop.f32.mrb[12].mxu0  ;;  %1653 = vmatmul.mubr.f32.gmra.mrb[10].mxu1 %v1600_v7 }
 0x18f   : > { %v582_v10 = vpop.f32.mrb[13].mxu0  ;;  %1826 = vmatpush3.bf16.msra.mxu1 %v1801_v57 }
 0x190   : > { %v1604_v11 = vpop.f32.mrb[14].mxu0  ;;  %1655 = vmatprep.mubr.f32.mxu1 %v582_v10  ;;  %1819 = vmatprep.subr.bf16.mxu1 %v1805_v60 }
 0x191   : > { %v585_v12 = vpop.f32.mrb[15].mxu0 }
 0x192   : > { %1656 = vmatmul.mubr.f32.gmra.mrb[12].mxu1 %v585_v12 }
 0x193   : > { %1658 = vmatprep.mubr.f32.mxu1 %v1603_v9  ;;  %1827 = vmatpush3.bf16.msra.mxu1 %v1805_v60 }
 0x194   : > { %1820 = vmatprep.subr.bf16.mxu1 %v1809_v15 }
 0x196   : > { %1659 = vmatmul.mubr.f32.gmra.mrb[14].mxu1 %v1604_v11 }
 0x197   : > { %1828 = vmatpush3.bf16.msra.mxu1 %v1809_v15 }
 0x24d   : > { %v1639_v17 = vpop.f32.mrb[0].mxu1 }
 0x24e   : > { %v741_v18 = vadd.f32 %v1639_v17, %v1462_v16  ;;  %v735_v19 = vpop.f32.mrb[1].mxu1 }
 0x24f   : > { %v736_v20 = vadd.f32 %v1462_v16, %v735_v19 }
 0x250   : > { %v815_v23 = vmax.f32 %v741_v18, 0.0 }
 0x251   : > { %v814_v21 = vmax.f32 %v736_v20, 0.0  ;;  %v1642_v22 = vpop.f32.mrb[2].mxu1 }
 0x252   : > { %v751_v24 = vadd.f32 %v1642_v22, %v1462_v16  ;;  %v745_v25 = vpop.f32.mrb[3].mxu1 }
 0x253   : > { %v746_v26 = vadd.f32 %v1462_v16, %v745_v25  ;;  %1693 = vmatprep.mubr.f32.mxu0 %v814_v21 }
 0x254   : > { %1694 = vmatmul.mubr.f32.vlgmr.msra.gmra.mrb[16].mxu0 %v815_v23  ;;  %v817_v29 = vmax.f32 %v751_v24, 0.0 }
 0x255   : > { %v816_v27 = vmax.f32 %v746_v26, 0.0  ;;  %v1645_v28 = vpop.f32.mrb[4].mxu1 }
 0x256   : > { %v761_v30 = vadd.f32 %v1645_v28, %v1462_v16  ;;  %v755_v31 = vpop.f32.mrb[5].mxu1 }
 0x257   : > { %v756_v32 = vadd.f32 %v1462_v16, %v755_v31  ;;  %1696 = vmatprep.mubr.f32.mxu0 %v816_v27 }
 0x258   : > { %1697 = vmatmul.mubr.f32.gmra.mrb[18].mxu0 %v817_v29  ;;  %v819_v35 = vmax.f32 %v761_v30, 0.0 }
 0x259   : > { %v818_v33 = vmax.f32 %v756_v32, 0.0  ;;  %v1648_v34 = vpop.f32.mrb[6].mxu1 }
 0x25a   : > { %v771_v36 = vadd.f32 %v1648_v34, %v1462_v16  ;;  %v765_v37 = vpop.f32.mrb[7].mxu1 }
 0x25b   : > { %v766_v38 = vadd.f32 %v1462_v16, %v765_v37  ;;  %1699 = vmatprep.mubr.f32.mxu0 %v818_v33 }
 0x25c   : > { %1700 = vmatmul.mubr.f32.gmra.mrb[20].mxu0 %v819_v35  ;;  %v821_v41 = vmax.f32 %v771_v36, 0.0 }
 0x25d   : > { %v820_v39 = vmax.f32 %v766_v38, 0.0  ;;  %v1651_v40 = vpop.f32.mrb[8].mxu1 }
 0x25e   : > { %v781_v42 = vadd.f32 %v1651_v40, %v1462_v16  ;;  %v775_v43 = vpop.f32.mrb[9].mxu1 }
 0x25f   : > { %v776_v44 = vadd.f32 %v1462_v16, %v775_v43  ;;  %1702 = vmatprep.mubr.f32.mxu0 %v820_v39 }
 0x260   : > { %1703 = vmatmul.mubr.f32.gmra.mrb[22].mxu0 %v821_v41  ;;  %v823_v47 = vmax.f32 %v781_v42, 0.0 }
 0x261   : > { %v822_v45 = vmax.f32 %v776_v44, 0.0  ;;  %v1654_v46 = vpop.f32.mrb[10].mxu1 }
 0x262   : > { %v791_v48 = vadd.f32 %v1654_v46, %v1462_v16  ;;  %v785_v49 = vpop.f32.mrb[11].mxu1 }
 0x263   : > { %v786_v50 = vadd.f32 %v1462_v16, %v785_v49  ;;  %1705 = vmatprep.mubr.f32.mxu1 %v822_v45 }
 0x264   : > { %1706 = vmatmul.mubr.f32.vlgmr.msra.gmra.mrb[16].mxu1 %v823_v47  ;;  %v825_v53 = vmax.f32 %v791_v48, 0.0 }
 0x265   : > { %v824_v51 = vmax.f32 %v786_v50, 0.0  ;;  %v1657_v52 = vpop.f32.mrb[12].mxu1 }
 0x266   : > { %v801_v54 = vadd.f32 %v1657_v52, %v1462_v16  ;;  %v795_v55 = vpop.f32.mrb[13].mxu1 }
 0x267   : > { %v796_v56 = vadd.f32 %v1462_v16, %v795_v55  ;;  %1708 = vmatprep.mubr.f32.mxu1 %v824_v51 }
 0x268   : > { %1709 = vmatmul.mubr.f32.gmra.mrb[18].mxu1 %v825_v53  ;;  %v827_v59 = vmax.f32 %v801_v54, 0.0 }
 0x269   : > { %v826_v57 = vmax.f32 %v796_v56, 0.0  ;;  %v1660_v58 = vpop.f32.mrb[14].mxu1 }
 0x26a   : > { %v811_v60 = vadd.f32 %v1660_v58, %v1462_v16  ;;  %v805_v61 = vpop.f32.mrb[15].mxu1 }
 0x26b   : > { %v806_v62 = vadd.f32 %v1462_v16, %v805_v61  ;;  %1711 = vmatprep.mubr.f32.mxu1 %v826_v57 }
 0x26c   : > { %1712 = vmatmul.mubr.f32.gmra.mrb[20].mxu1 %v827_v59  ;;  %v829_v0 = vmax.f32 %v811_v60, 0.0 }
 0x26d   : > { %v828_v63 = vmax.f32 %v806_v62, 0.0 }
 0x26f   : > { %1714 = vmatprep.mubr.f32.mxu1 %v828_v63 }
 0x270   : > { %1715 = vmatmul.mubr.f32.gmra.mrb[22].mxu1 %v829_v0 }
 0x327   : > { %v1695_v1 = vpop.f32.mrb[16].mxu0 }
 0x328   : > { %v912_v2 = vpop.f32.mrb[17].mxu0 }
 0x329   : > { %v991_v3 = vpack.c.bf16 %v1695_v1, %v912_v2 }
 0x32b   : > { %1002 = vst [vmem:[#allocation4] sm:$0xff] %v991_v3  ;;  %v1698_v4 = vpop.f32.mrb[18].mxu0 }
 0x32c   : > { %v922_v5 = vpop.f32.mrb[19].mxu0 }
 0x32d   : > { %v992_v6 = vpack.c.bf16 %v1698_v4, %v922_v5 }
 0x32f   : > { %1003 = vst [vmem:[#allocation4 + $0x8] sm:$0xff] %v992_v6  ;;  %v1701_v7 = vpop.f32.mrb[20].mxu0 }
 0x330   : > { %v932_v8 = vpop.f32.mrb[21].mxu0 }
 0x331   : > { %v993_v9 = vpack.c.bf16 %v1701_v7, %v932_v8 }
 0x333   : > { %1004 = vst [vmem:[#allocation4 + $0x10] sm:$0xff] %v993_v9  ;;  %v1704_v10 = vpop.f32.mrb[22].mxu0 }
 0x334   : > { %v942_v11 = vpop.f32.mrb[23].mxu0 }
 0x335   : > { %v994_v12 = vpack.c.bf16 %v1704_v10, %v942_v11 }
 0x337   : > { %1005 = vst [vmem:[#allocation4 + $0x18] sm:$0xff] %v994_v12  ;;  %v1707_v13 = vpop.f32.mrb[16].mxu1 }
 0x338   : > { %v952_v14 = vpop.f32.mrb[17].mxu1 }
 0x339   : > { %v995_v15 = vpack.c.bf16 %v1707_v13, %v952_v14 }
 0x33b   : > { %1006 = vst [vmem:[#allocation4 + $0x20] sm:$0xff] %v995_v15  ;;  %v1710_v16 = vpop.f32.mrb[18].mxu1 }
 0x33c   : > { %v962_v17 = vpop.f32.mrb[19].mxu1 }
 0x33d   : > { %v996_v18 = vpack.c.bf16 %v1710_v16, %v962_v17 }
 0x33f   : > { %1007 = vst [vmem:[#allocation4 + $0x28] sm:$0xff] %v996_v18  ;;  %v1713_v19 = vpop.f32.mrb[20].mxu1 }
 0x340   : > { %v972_v20 = vpop.f32.mrb[21].mxu1 }
 0x341   : > { %v997_v21 = vpack.c.bf16 %v1713_v19, %v972_v20 }
 0x343   : > { %1008 = vst [vmem:[#allocation4 + $0x30] sm:$0xff] %v997_v21  ;;  %v1716_v22 = vpop.f32.mrb[22].mxu1 }
 0x344   : > { %v982_v23 = vpop.f32.mrb[23].mxu1 }
 0x345   : > { %v998_v24 = vpack.c.bf16 %v1716_v22, %v982_v23 }
 0x347   : > { %1009 = vst [vmem:[#allocation4 + $0x38] sm:$0xff] %v998_v24 }
 0x348 PF: > { %p1463_p4 = scmp.ne.s32.totalorder %s2126_s18, 1 }
 0x349   : > { %v1074_v25 = vld [vmem:[#allocation4] sm:$0xff] (!%p1463_p4)  ;;  %v1075_v26 = vld [vmem:[#allocation4 + $0x8] sm:$0xff] (!%p1463_p4)  ;;  %v1076_v27 = vld [vmem:[#allocation4 + $0x10] sm:$0xff] (!%p1463_p4) }
 0x34a   : > { %1013 = sbr.rel (%p1463_p4) target bundleno = 1100 (0x44c), region = 72  ;;  %1717 = vmatprep.subr.bf16.mxu0 (!%p1463_p4), %v1074_v25  ;;  %1829 = vmatprep.subr.bf16.mxu1 (!%p1463_p4), %v1074_v25  ;;  %v1946_v28 = vld [vmem:[#allocation5] sm:$0xff] (!%p1463_p4)   ;;  %v1077_v30 = vld [vmem:[#allocation4 + $0x18] sm:$0xff] (!%p1463_p4)  ;;  %v1079_v32 = vld [vmem:[#allocation4 + $0x28] sm:$0xff] (!%p1463_p4) }
 0x34b   : > { %1718 = vmatpush3.bf16.msra.mxu0 (!%p1463_p4), %v1074_v25  ;;  %1837 = vmatpush3.bf16.msra.mxu1 (!%p1463_p4), %v1074_v25  ;;  %v1947_v29 = vld [vmem:[#allocation5 + $0x20] sm:$0xff] (!%p1463_p4)   ;;  %v1080_v33 = vld [vmem:[#allocation4 + $0x30] sm:$0xff] (!%p1463_p4)  ;;  %v1948_v35 = vld [vmem:[#allocation5 + $0x8] sm:$0xff] (!%p1463_p4)  }
 0x34c   : > { %1719 = vmatprep.subr.bf16.mxu0 (!%p1463_p4), %v1075_v26  ;;  %1830 = vmatprep.subr.bf16.mxu1 (!%p1463_p4), %v1075_v26  ;;  %v1078_v31 = vld [vmem:[#allocation4 + $0x20] sm:$0xff] (!%p1463_p4)  ;;  %v1949_v36 = vld [vmem:[#allocation5 + $0x28] sm:$0xff] (!%p1463_p4)   ;;  %v1950_v37 = vld [vmem:[#allocation5 + $0x10] sm:$0xff] (!%p1463_p4)  }
 0x34d   : > { %1733 = vmatprep.mubr.bf16.mxu0 (!%p1463_p4), %v1946_v28  ;;  %1741 = vmatprep.mubr.bf16.mxu1 (!%p1463_p4), %v1947_v29  ;;  %v1951_v38 = vld [vmem:[#allocation5 + $0x30] sm:$0xff] (!%p1463_p4)   ;;  %v1952_v39 = vld [vmem:[#allocation5 + $0x18] sm:$0xff] (!%p1463_p4)   ;;  %v1464_v41 = vld [vmem:[%s2377_s4 + $0x1] ss:$0 sm:$0xff] (!%p1463_p4) }
 0x34e   : > { %v1081_v34 = vld [vmem:[#allocation4 + $0x38] sm:$0xff] (!%p1463_p4) }
 0x34f   : > { %1720 = vmatpush3.bf16.msra.mxu0 (!%p1463_p4), %v1075_v26  ;;  %1838 = vmatpush3.bf16.msra.mxu1 (!%p1463_p4), %v1075_v26  ;;  %v1953_v40 = vld [vmem:[#allocation5 + $0x38] sm:$0xff] (!%p1463_p4)  }
 0x350   : > { %1721 = vmatprep.subr.bf16.mxu0 (!%p1463_p4), %v1076_v27  ;;  %1831 = vmatprep.subr.bf16.mxu1 (!%p1463_p4), %v1076_v27 }
 0x353   : > { %1722 = vmatpush3.bf16.msra.mxu0 %v1076_v27  ;;  %1839 = vmatpush3.bf16.msra.mxu1 %v1076_v27 }
 0x354   : > { %1723 = vmatprep.subr.bf16.mxu0 %v1077_v30  ;;  %1832 = vmatprep.subr.bf16.mxu1 %v1077_v30 }
 0x357   : > { %1724 = vmatpush3.bf16.msra.mxu0 %v1077_v30  ;;  %1840 = vmatpush3.bf16.msra.mxu1 %v1077_v30 }
 0x358   : > { %1725 = vmatprep.subr.bf16.mxu0 %v1078_v31  ;;  %1833 = vmatprep.subr.bf16.mxu1 %v1078_v31 }
 0x35b   : > { %1726 = vmatpush3.bf16.msra.mxu0 %v1078_v31  ;;  %1841 = vmatpush3.bf16.msra.mxu1 %v1078_v31 }
 0x35c   : > { %1727 = vmatprep.subr.bf16.mxu0 %v1079_v32  ;;  %1834 = vmatprep.subr.bf16.mxu1 %v1079_v32 }
 0x35f   : > { %1728 = vmatpush3.bf16.msra.mxu0 %v1079_v32  ;;  %1842 = vmatpush3.bf16.msra.mxu1 %v1079_v32 }
 0x360   : > { %1729 = vmatprep.subr.bf16.mxu0 %v1080_v33  ;;  %1835 = vmatprep.subr.bf16.mxu1 %v1080_v33 }
 0x363   : > { %1730 = vmatpush3.bf16.msra.mxu0 %v1080_v33  ;;  %1843 = vmatpush3.bf16.msra.mxu1 %v1080_v33 }
 0x364   : > { %1731 = vmatprep.subr.bf16.mxu0 %v1081_v34  ;;  %1836 = vmatprep.subr.bf16.mxu1 %v1081_v34 }
 0x367   : > { %1732 = vmatpush3.bf16.msra.mxu0 %v1081_v34  ;;  %1844 = vmatpush3.bf16.msra.mxu1 %v1081_v34 }
 0x36a   : > { %1734 = vmatmul.mubr.bf16.vlgmr.msra.gmra.mrb[0].mxu0 %v1948_v35  ;;  %1742 = vmatmul.mubr.bf16.vlgmr.msra.gmra.mrb[0].mxu1 %v1949_v36 }
 0x36b   : > { %1737 = vmatprep.mubr.bf16.mxu0 %v1950_v37  ;;  %1745 = vmatprep.mubr.bf16.mxu1 %v1951_v38 }
 0x372   : > { %1738 = vmatmul.mubr.bf16.gmra.mrb[4].mxu0 %v1952_v39  ;;  %1746 = vmatmul.mubr.bf16.gmra.mrb[4].mxu1 %v1953_v40 }
 0x43d   : > { %v1735_v42 = vpop.f32.mrb[0].mxu0  ;;  %v1743_v43 = vpop.f32.mrb[0].mxu1 }
 0x43e   : > { %v1229_v44 = vadd.f32 %v1735_v42, %v1464_v41  ;;  %v1237_v45 = vadd.f32 %v1743_v43, %v1464_v41  ;;  %v1164_v46 = vpop.f32.mrb[1].mxu0  ;;  %v1196_v47 = vpop.f32.mrb[1].mxu1 }
 0x43f   : > { %v1227_v48 = vadd.f32 %v1464_v41, %v1164_v46  ;;  %v1235_v49 = vadd.f32 %v1464_v41, %v1196_v47  ;;  %v1736_v50 = vpop.f32.mrb[2].mxu0  ;;  %v1744_v51 = vpop.f32.mrb[2].mxu1 }
 0x440   : > { %1280 = vst [vmem:[#allocation13 + $0x10] sm:$0xff] %v1229_v44  ;;  %1288 = vst [vmem:[#allocation13 + $0x50] sm:$0xff] %v1237_v45  ;;  %v1230_v52 = vadd.f32 %v1736_v50, %v1464_v41  ;;  %v1238_v53 = vadd.f32 %v1744_v51, %v1464_v41  ;;  %v1167_v54 = vpop.f32.mrb[3].mxu0  ;;  %v1199_v55 = vpop.f32.mrb[3].mxu1 }
 0x441   : > { %1278 = vst [vmem:[#allocation13] sm:$0xff] %v1227_v48  ;;  %1286 = vst [vmem:[#allocation13 + $0x40] sm:$0xff] %v1235_v49  ;;  %v1228_v56 = vadd.f32 %v1464_v41, %v1167_v54  ;;  %v1236_v57 = vadd.f32 %v1464_v41, %v1199_v55 }
 0x442   : > { %1281 = vst [vmem:[#allocation13 + $0x18] sm:$0xff] %v1230_v52  ;;  %1289 = vst [vmem:[#allocation13 + $0x58] sm:$0xff] %v1238_v53 }
 0x443   : > { %1279 = vst [vmem:[#allocation13 + $0x8] sm:$0xff] %v1228_v56  ;;  %1287 = vst [vmem:[#allocation13 + $0x48] sm:$0xff] %v1236_v57 }
 0x445   : > { %v1739_v58 = vpop.f32.mrb[4].mxu0  ;;  %v1747_v59 = vpop.f32.mrb[4].mxu1 }
 0x446   : > { %v1233_v60 = vadd.f32 %v1739_v58, %v1464_v41  ;;  %v1241_v61 = vadd.f32 %v1747_v59, %v1464_v41  ;;  %v1180_v62 = vpop.f32.mrb[5].mxu0  ;;  %v1212_v63 = vpop.f32.mrb[5].mxu1 }
 0x447   : > { %v1231_v0 = vadd.f32 %v1464_v41, %v1180_v62  ;;  %v1239_v1 = vadd.f32 %v1464_v41, %v1212_v63  ;;  %v1740_v2 = vpop.f32.mrb[6].mxu0  ;;  %v1748_v3 = vpop.f32.mrb[6].mxu1 }
 0x448   : > { %1284 = vst [vmem:[#allocation13 + $0x30] sm:$0xff] %v1233_v60  ;;  %1292 = vst [vmem:[#allocation13 + $0x70] sm:$0xff] %v1241_v61  ;;  %v1234_v4 = vadd.f32 %v1740_v2, %v1464_v41  ;;  %v1242_v5 = vadd.f32 %v1748_v3, %v1464_v41  ;;  %v1183_v6 = vpop.f32.mrb[7].mxu0  ;;  %v1215_v7 = vpop.f32.mrb[7].mxu1 }
 0x449   : > { %1282 = vst [vmem:[#allocation13 + $0x20] sm:$0xff] %v1231_v0  ;;  %1290 = vst [vmem:[#allocation13 + $0x60] sm:$0xff] %v1239_v1  ;;  %v1232_v8 = vadd.f32 %v1464_v41, %v1183_v6  ;;  %v1240_v9 = vadd.f32 %v1464_v41, %v1215_v7 }
 0x44a   : > { %1285 = vst [vmem:[#allocation13 + $0x38] sm:$0xff] %v1234_v4  ;;  %1293 = vst [vmem:[#allocation13 + $0x78] sm:$0xff] %v1242_v5 }
 0x44b   : > { %1283 = vst [vmem:[#allocation13 + $0x28] sm:$0xff] %v1232_v8  ;;  %1291 = vst [vmem:[#allocation13 + $0x68] sm:$0xff] %v1240_v9 }
 0x44c PF: > { %p1892_p7 = scmp.eq.s32.totalorder %s2193_s23, 1  ;;  %s2144_s8 = smov [#allocation13]  }
 0x44d   : > { %s1309_s30 = sshll.u32 %s2144_s8, 4  ;;  %s1310_s30 = int_to_ptr.vmem [resolvable:$true] %s1309_s30 }
 0x44e   : > { %s2066_s26 = scalar_lea.vmem %s1310_s30, 2048  ;;  %s2072_s6 = scalar_lea.vmem %s1310_s30, 4096 }
 0x44f   : > { %p2067_p8 = scmp.ne.s32.totalorder %s1310_s30, %s2066_s26  ;;  %p2073_p6 = scmp.lt.s32.totalorder %s1310_s30, %s1310_s30 }
 0x450   : > { %p2074_p3 = scmp.lt.s32.totalorder %s2072_s6, %s2066_s26 }
 0x451   : > { %p2068_p5 = pnand %p2067_p8, %p1892_p7 }
 0x452   : > { %p2075_p10 = por %p2074_p3, %p2073_p6 }
 0x453   : > { %p2069_p2 = pneg %p2068_p5 }
 0x455   : > { %p2076_p11 = pnand %p2075_p10, %p2069_p2 }
 0x457   : > { %2079 = shalt.err (!%p2076_p11)
}
 0x458   : > { %s2080_s22 = scalar_lea.hbm %s2378_s5, 2048 }
 0x459   : > { %p2081_p9 = scmp.ne.s32.totalorder %s2378_s5, %s2080_s22  ;;  %p2086_p0 = scmp.lt.u32.totalorder %s2080_s22, %s2378_s5 }
 0x45b   : > { %p2082_p12 = pnand %p2081_p9, %p1892_p7 }
 0x45d   : > { %p2083_p13 = pneg %p2082_p12 }
 0x45f   : > { %p2088_p1 = pnand %p2086_p0, %p2083_p13 }
 0x461   : > { %2091 = shalt.err (!%p2088_p1)
}
 0x462   : > { %s2145_s28 = smov 128   ;;  %s2146_s17 = smov 8  }
 0x463   : > { %1862 = dma.vmem_to_hbm [thread:$0]  (%p1892_p7), %s1310_s30, 2048, %s2378_s5, [#allocation7], %s2145_s28, %s2145_s28, %s2146_s17  }
 0x464 PF: > { %p1894_p4 = scmp.eq.s32.totalorder %s1433_s24, 1  ;;  %p2396_p8 = scmp.ge.s32.totalorder %s2134_s20, 2 }
 0x466   : > { %p1880_p5 = pnand %p1894_p4, %p2396_p8 }
 0x468   : > { %2121 = dma.done.wait (!%p1880_p5), [#allocation7], 2048  }
 0x469   : > { %2123 = vsyncadd (!%p1880_p5), [#allocation7], 4294965248  ;;  %s23_s20 = sadd.s32 1, %s2134_s20   ;;  %s2397_s18 = smov %s2130_s19 }
 0x46a   : > { %p20_p2 = scmp.ge.s32.totalorder %s23_s20, 4   ;;  %s2398_s19 = smov %s2400_s27 }
 0x46c   :  { %22 = sbr.rel (!%p20_p2) target bundleno = 7 (0x7), region = 125 }
 0x473   :  { %1330 = vsyncpa [#allocation6], 1 }
 0x474   :  { %1332 = vsyncpa [#allocation6 + $0x1], 1 }
 0x475   :  { %1333 = vsyncpa [#allocation9], 1 }
 0x476   :  { %1335 = vsyncpa [#allocation9 + $0x1], 1 }
 0x477   :  { %1336 = vsyncpa [#allocation12], 1 }
 0x478   :  { %1337 = vsyncpa [#allocation7], 1 }
 0x479   :  { %1339 = vsyncpa [#allocation7 + $0x1], 1 }

</bundles_post_ra>
